<compile_context>
chip_gen: v5e
topology: v5e:2x2
jax: 0.10.0
libtpu: 0.0.40
codegen_flags: <defaults>
</compile_context>

<pallas_src>
import jax
import jax.numpy as jnp
from jax.experimental import pallas as pl
from jax.experimental.pallas import tpu as pltpu

_MiB = 1024 * 1024


def _round_up(x: int, m: int) -> int:
    return ((x + m - 1) // m) * m


# ---------------------------------------------------------------------------
# Per-generation tuning knobs (memory-bound on W1 -> fat tiles, big VMEM).
# ---------------------------------------------------------------------------
_GEN_CFG = {
    # v5e: 128 MiB VMEM, ~0.8 TB/s HBM -> deep K tiles keep the DMA pipe full.
    "v5e": dict(tm_cap=256, tk_target=1024, vmem_limit=80 * _MiB),
    # v6e: 128 MiB VMEM, 256-wide MXU -> tm up to 256, tk 1024.
    "v6e": dict(tm_cap=256, tk_target=1024, vmem_limit=80 * _MiB),
    # v7x: only 64 MiB VMEM per TC -> conservative tk and <=48 MiB budget.
    "v7x": dict(tm_cap=256, tk_target=512, vmem_limit=48 * _MiB),
    # Unknown hardware: safe defaults.
    "default": dict(tm_cap=128, tk_target=512, vmem_limit=32 * _MiB),
}


def _tpu_generation() -> str:
    try:
        kind = jax.devices()[0].device_kind.lower()
    except Exception:
        return "default"
    if "v7" in kind:
        return "v7x"
    if "v6" in kind:
        return "v6e"
    if "v5" in kind:
        return "v5e"
    return "default"


def _vmem_bytes_est(tm: int, tk: int, h_pad: int, c_pad: int) -> int:
    """Rough per-pallas_call VMEM footprint for the chosen tiling."""
    return (
        2 * tm * tk * 2          # x tile, double-buffered, bf16
        + 2 * tk * h_pad * 2     # W1 K-slice, double-buffered, bf16
        + 1 * h_pad * c_pad * 2  # W2, single-buffered (Buffered(1)), bf16
        + h_pad * 4 + c_pad * 4  # biases, f32
        + tm * h_pad * 4         # f32 accumulator scratch
        + 2 * tm * c_pad * 4     # output tile, double-buffered, f32
    )


def _pick_tiles(B: int, d_pad: int, h_pad: int, c_pad: int, cfg: dict):
    """Pick (tm, tk): fat tiles first, shrink until they fit the VMEM budget."""
    # K-tile candidates: multiples of 256 dividing D_pad, near tk_target, descending.
    tk_all = [t for t in range(256, d_pad + 1, 256) if d_pad % t == 0]
    tk_cands = sorted([t for t in tk_all if t <= cfg["tk_target"]], reverse=True)
    if not tk_cands:
        tk_cands = [min(tk_all) if tk_all else d_pad]

    # M-tile candidates: cover the batch in as few tiles as possible.
    if B <= 16:
        tm_cands = [16]                      # bf16 packs 16 sublanes per vreg
    else:
        tm_top = min(_round_up(min(B, 512), 128), cfg["tm_cap"])
        tm_cands = list(range(tm_top, 127, -128)) or [128]

    budget = int(0.9 * cfg["vmem_limit"])
    for tm in tm_cands:
        for tk in tk_cands:
            if _vmem_bytes_est(tm, tk, h_pad, c_pad) <= budget:
                return tm, tk
    return tm_cands[-1], tk_cands[-1]        # fallback: smallest candidates


# ---------------------------------------------------------------------------
# One-time parameter preparation (pad + cast to bf16, done once, not per call).
# ---------------------------------------------------------------------------
def prepare_params(w1, b1, w2, b2):
    """w1: (D, hidden), b1: (hidden,), w2: (hidden, C), b2: (C,)."""
    D, hidden = w1.shape
    C = w2.shape[1]
    d_pad = _round_up(D, 256)
    h_pad = _round_up(hidden, 128)
    c_pad = _round_up(C, 128)

    w1_p = jnp.zeros((d_pad, h_pad), jnp.bfloat16).at[:D, :hidden].set(
        w1.astype(jnp.bfloat16))
    b1_p = jnp.zeros((1, h_pad), jnp.float32).at[:, :hidden].set(
        b1.astype(jnp.float32))
    w2_p = jnp.zeros((h_pad, c_pad), jnp.bfloat16).at[:hidden, :C].set(
        w2.astype(jnp.bfloat16))
    b2_p = jnp.zeros((1, c_pad), jnp.float32).at[:, :C].set(
        b2.astype(jnp.float32))

    return dict(w1=w1_p, b1=b1_p, w2=w2_p, b2=b2_p,
                D=D, hidden=hidden, C=C,
                D_pad=d_pad, H_pad=h_pad, C_pad=c_pad)


# ---------------------------------------------------------------------------
# Kernel: grid = (M tiles, K tiles), K (input-dim reduction) innermost.
# ---------------------------------------------------------------------------
def mlp_kernel(x_ref, w1_ref, b1_ref, w2_ref, b2_ref, o_ref, acc_ref):
    k = pl.program_id(1)

    @pl.when(k == 0)
    def _():
        acc_ref[...] = jnp.zeros_like(acc_ref)

    # fc1 partial product for this K slice: bf16 x bf16 -> f32 on the MXU.
    acc_ref[...] += jnp.dot(x_ref[...], w1_ref[...],
                            preferred_element_type=jnp.float32)

    # Epilogue once, on the last K step: bias + ReLU (f32 VPU), then fc2.
    @pl.when(k == pl.num_programs(1) - 1)
    def _():
        h = acc_ref[...] + b1_ref[...]              # (tm, Hp) + (1, Hp), f32
        h = jnp.maximum(h, 0.0)                     # ReLU in f32
        out = jnp.dot(h.astype(w2_ref.dtype), w2_ref[...],
                      preferred_element_type=jnp.float32)
        o_ref[...] = (out + b2_ref[...]).astype(o_ref.dtype)


# ---------------------------------------------------------------------------
# Per-call forward: only x is flattened / padded / cast here.
# ---------------------------------------------------------------------------
def mlp_classifier_forward(x, params):
    B = x.shape[0]
    D, hidden, C = params["D"], params["hidden"], params["C"]
    d_pad, h_pad, c_pad = params["D_pad"], params["H_pad"], params["C_pad"]

    cfg = _GEN_CFG[_tpu_generation()]
    tm, tk = _pick_tiles(B, d_pad, h_pad, c_pad, cfg)
    b_pad = _round_up(max(B, tm), tm)

    # Flatten exactly like torch .view(B, -1); zero padding is exact
    # (padded K / hidden columns contribute 0, padded rows sliced off below).
    x_flat = x.reshape(B, D)
    x_p = jnp.zeros((b_pad, d_pad), jnp.bfloat16).at[:B, :D].set(
        x_flat.astype(jnp.bfloat16))

    num_m = b_pad // tm
    num_k = d_pad // tk
    grid = (num_m, num_k)

    flops = 2 * b_pad * d_pad * h_pad + 2 * b_pad * h_pad * c_pad
    bytes_accessed = (
        b_pad * d_pad * 2            # x streamed once
        + num_m * d_pad * h_pad * 2  # W1 re-streamed once per M tile
        + h_pad * c_pad * 2          # W2
        + h_pad * 4 + c_pad * 4      # biases
        + b_pad * c_pad * 4          # output
    )

    out = pl.pallas_call(
        mlp_kernel,
        out_shape=jax.ShapeDtypeStruct((b_pad, c_pad), jnp.float32),
        grid_spec=pltpu.PrefetchScalarGridSpec(
            num_scalar_prefetch=0,
            grid=grid,
            in_specs=[
                # Streamed tiles (double-buffered by default):
                pl.BlockSpec((tm, tk), lambda m, k: (m, k)),       # x tile
                pl.BlockSpec((tk, h_pad), lambda m, k: (k, 0)),    # W1 K-slice
                # Constant blocks: single buffer is enough (index never moves).
                pl.BlockSpec((1, h_pad), lambda m, k: (0, 0),
                             pipeline_mode=pl.Buffered(1)),        # b1
                pl.BlockSpec((h_pad, c_pad), lambda m, k: (0, 0),
                             pipeline_mode=pl.Buffered(1)),        # W2
                pl.BlockSpec((1, c_pad), lambda m, k: (0, 0),
                             pipeline_mode=pl.Buffered(1)),        # b2
            ],
            out_specs=pl.BlockSpec((tm, c_pad), lambda m, k: (m, 0)),
            scratch_shapes=[pltpu.VMEM((tm, h_pad), jnp.float32)],
        ),
        compiler_params=pltpu.CompilerParams(
            dimension_semantics=("parallel", "arbitrary"),
            vmem_limit_bytes=cfg["vmem_limit"],
        ),
        cost_estimate=pl.CostEstimate(
            flops=flops, transcendentals=0, bytes_accessed=bytes_accessed),
    )(x_p, params["w1"], params["b1"], params["w2"], params["b2"])

    return out[:B, :C]


# ---------------------------------------------------------------------------
# Deterministic init mirroring nn.Linear shapes (stored as (in, out)).
# ---------------------------------------------------------------------------
def init_params(key, h, w, num_classes, hidden_dim):
    in_dim = 3 * h * w
    k1, k2, k3, k4 = jax.random.split(key, 4)
    lim1 = 1.0 / jnp.sqrt(in_dim)
    lim2 = 1.0 / jnp.sqrt(hidden_dim)
    w1 = jax.random.uniform(k1, (in_dim, hidden_dim), jnp.float32, -lim1, lim1)
    b1 = jax.random.uniform(k2, (hidden_dim,), jnp.float32, -lim1, lim1)
    w2 = jax.random.uniform(k3, (hidden_dim, num_classes), jnp.float32, -lim2, lim2)
    b2 = jax.random.uniform(k4, (num_classes,), jnp.float32, -lim2, lim2)
    return w1, b1, w2, b2


if __name__ == "__main__":
    # Small shapes consistent with the module's forward: (B, 3, H, W).
    B, H, W = 2, 16, 16
    num_classes, hidden_dim = 6, 128

    key = jax.random.PRNGKey(0)
    kx, kp = jax.random.split(key)
    x = jax.random.normal(kx, (B, 3, H, W), jnp.float32)
    w1, b1, w2, b2 = init_params(kp, H, W, num_classes, hidden_dim)

    # One-time parameter prep (pad + bf16 cast) — not part of the per-call path.
    params = prepare_params(w1, b1, w2, b2)

    logits = mlp_classifier_forward(x, params)
    logits = jax.block_until_ready(logits)
    assert logits.shape == (B, num_classes)

    # Reference 1: same bf16-input / f32-accumulate math as the kernel.
    x_flat = x.reshape(B, -1)
    h_ref = jnp.maximum(
        jnp.dot(x_flat.astype(jnp.bfloat16), w1.astype(jnp.bfloat16),
                preferred_element_type=jnp.float32) + b1, 0.0)
    ref_bf16 = jnp.dot(h_ref.astype(jnp.bfloat16), w2.astype(jnp.bfloat16),
                       preferred_element_type=jnp.float32) + b2
    assert jnp.allclose(logits, ref_bf16, atol=1e-3, rtol=1e-3)

    # Reference 2: pure f32 torch-equivalent math (looser tol: bf16 MXU inputs).
    ref_f32 = jnp.maximum(x_flat @ w1 + b1, 0.0) @ w2 + b2
    assert jnp.allclose(logits, ref_f32, atol=5e-2, rtol=5e-2)

    print("KERNEL_OK")
</pallas_src>

<mosaic_0001>
module attributes {stable_mosaic.version = 11 : i64} {
  func.func @mlp_kernel(%arg0: i32, %arg1: i32, %arg2: memref<16x256xbf16, #tpu.memory_space<vmem>>, %arg3: memref<256x128xbf16, #tpu.memory_space<vmem>>, %arg4: memref<1x128xf32, #tpu.memory_space<vmem>>, %arg5: memref<128x128xbf16, #tpu.memory_space<vmem>>, %arg6: memref<1x128xf32, #tpu.memory_space<vmem>>, %arg7: memref<16x128xf32, #tpu.memory_space<vmem>>, %arg8: memref<16x128xf32, #tpu.memory_space<vmem>>) attributes {dimension_semantics = [#tpu.dimension_semantics<parallel>, #tpu.dimension_semantics<arbitrary>], iteration_bounds = array<i64: 1, 3>, scalar_prefetch = 0 : i64, scratch_operands = 1 : i64, tpu.core_type = #tpu.core_type<tc>, window_params = [{transform_indices = @transform_0, window_bounds = array<i64: 16, 256>}, {transform_indices = @transform_1, window_bounds = array<i64: 256, 128>}, {pipeline_mode = #tpu.pipeline_mode<synchronous>, transform_indices = @transform_2, window_bounds = array<i64: 1, 128>}, {pipeline_mode = #tpu.pipeline_mode<synchronous>, transform_indices = @transform_3, window_bounds = array<i64: 128, 128>}, {pipeline_mode = #tpu.pipeline_mode<synchronous>, transform_indices = @transform_4, window_bounds = array<i64: 1, 128>}, {transform_indices = @transform_5, window_bounds = array<i64: 16, 128>}]} {
    %c0_i32 = arith.constant 0 : i32
    %0 = arith.cmpi eq, %arg1, %c0_i32 : i32
    %1 = arith.extui %0 : i1 to i32
    %c0_i32_0 = arith.constant 0 : i32
    %2 = arith.cmpi ne, %1, %c0_i32_0 : i32
    scf.if %2 {
      %cst_9 = arith.constant 0.000000e+00 : f32
      %12 = vector.broadcast %cst_9 : f32 to vector<16x128xf32>
      %c0_10 = arith.constant 0 : index
      %c0_11 = arith.constant 0 : index
      %13 = vector.load %arg8[%c0_10, %c0_11] : memref<16x128xf32, #tpu.memory_space<vmem>>, vector<16x128xf32>
      tpu.vector_store %arg8[%c0_10, %c0_11], %12 {strides = array<i32>} : memref<16x128xf32, #tpu.memory_space<vmem>>, vector<16x128xf32>,
    } else {
    }
    %c0 = arith.constant 0 : index
    %c0_1 = arith.constant 0 : index
    %3 = vector.load %arg8[%c0, %c0_1] : memref<16x128xf32, #tpu.memory_space<vmem>>, vector<16x128xf32>
    %c0_2 = arith.constant 0 : index
    %c0_3 = arith.constant 0 : index
    %4 = vector.load %arg2[%c0_2, %c0_3] : memref<16x256xbf16, #tpu.memory_space<vmem>>, vector<16x256xbf16>
    %c0_4 = arith.constant 0 : index
    %c0_5 = arith.constant 0 : index
    %5 = vector.load %arg3[%c0_4, %c0_5] : memref<256x128xbf16, #tpu.memory_space<vmem>>, vector<256x128xbf16>
    %cst = arith.constant dense<0.000000e+00> : vector<16x128xf32>
    %6 = tpu.matmul %4, %5, %cst {dimension_numbers = #tpu.dot_dimension_numbers<[1], [0], [0], [1], [0, 0, 1, 1], [], []>} : vector<16x256xbf16>, vector<256x128xbf16>, vector<16x128xf32> -> vector<16x128xf32>
    %7 = arith.addf %3, %6 : vector<16x128xf32>
    %c0_6 = arith.constant 0 : index
    %c0_7 = arith.constant 0 : index
    %8 = vector.load %arg8[%c0_6, %c0_7] : memref<16x128xf32, #tpu.memory_space<vmem>>, vector<16x128xf32>
    tpu.vector_store %arg8[%c0_6, %c0_7], %7 {strides = array<i32>} : memref<16x128xf32, #tpu.memory_space<vmem>>, vector<16x128xf32>,
    %c2_i32 = arith.constant 2 : i32
    %9 = arith.cmpi eq, %arg1, %c2_i32 : i32
    %10 = arith.extui %9 : i1 to i32
    %c0_i32_8 = arith.constant 0 : i32
    %11 = arith.cmpi ne, %10, %c0_i32_8 : i32
    scf.if %11 {
      %c0_9 = arith.constant 0 : index
      %c0_10 = arith.constant 0 : index
      %12 = vector.load %arg8[%c0_9, %c0_10] : memref<16x128xf32, #tpu.memory_space<vmem>>, vector<16x128xf32>
      %c0_11 = arith.constant 0 : index
      %c0_12 = arith.constant 0 : index
      %13 = vector.load %arg4[%c0_11, %c0_12] : memref<1x128xf32, #tpu.memory_space<vmem>>, vector<1x128xf32>
      %14 = vector.broadcast %13 : vector<1x128xf32> to vector<16x128xf32>
      %15 = arith.addf %12, %14 : vector<16x128xf32>
      %cst_13 = arith.constant 0.000000e+00 : f32
      %16 = vector.broadcast %cst_13 : f32 to vector<16x128xf32>
      %17 = arith.maximumf %15, %16 : vector<16x128xf32>
      %18 = arith.truncf %17 : vector<16x128xf32> to vector<16x128xbf16>
      %c0_14 = arith.constant 0 : index
      %c0_15 = arith.constant 0 : index
      %19 = vector.load %arg5[%c0_14, %c0_15] : memref<128x128xbf16, #tpu.memory_space<vmem>>, vector<128x128xbf16>
      %cst_16 = arith.constant dense<0.000000e+00> : vector<16x128xf32>
      %20 = tpu.matmul %18, %19, %cst_16 {dimension_numbers = #tpu.dot_dimension_numbers<[1], [0], [0], [1], [0, 0, 1, 1], [], []>} : vector<16x128xbf16>, vector<128x128xbf16>, vector<16x128xf32> -> vector<16x128xf32>
      %c0_17 = arith.constant 0 : index
      %c0_18 = arith.constant 0 : index
      %21 = vector.load %arg6[%c0_17, %c0_18] : memref<1x128xf32, #tpu.memory_space<vmem>>, vector<1x128xf32>
      %22 = vector.broadcast %21 : vector<1x128xf32> to vector<16x128xf32>
      %23 = arith.addf %20, %22 : vector<16x128xf32>
      %c0_19 = arith.constant 0 : index
      %c0_20 = arith.constant 0 : index
      %24 = vector.load %arg7[%c0_19, %c0_20] : memref<16x128xf32, #tpu.memory_space<vmem>>, vector<16x128xf32>
      tpu.vector_store %arg7[%c0_19, %c0_20], %23 {strides = array<i32>} : memref<16x128xf32, #tpu.memory_space<vmem>>, vector<16x128xf32>,
    } else {
    }
    return
  }
  func.func @transform_0(%arg0: i32, %arg1: i32) -> (i32, i32) {
    %c0_i32 = arith.constant 0 : i32
    return %arg0, %arg1 : i32, i32
  }
  func.func @transform_1(%arg0: i32, %arg1: i32) -> (i32, i32) {
    %c0_i32 = arith.constant 0 : i32
    %c0_i32_0 = arith.constant 0 : i32
    return %arg1, %c0_i32 : i32, i32
  }
  func.func @transform_2(%arg0: i32, %arg1: i32) -> (i32, i32) {
    %c0_i32 = arith.constant 0 : i32
    %c0_i32_0 = arith.constant 0 : i32
    %c0_i32_1 = arith.constant 0 : i32
    return %c0_i32, %c0_i32_0 : i32, i32
  }
  func.func @transform_3(%arg0: i32, %arg1: i32) -> (i32, i32) {
    %c0_i32 = arith.constant 0 : i32
    %c0_i32_0 = arith.constant 0 : i32
    %c0_i32_1 = arith.constant 0 : i32
    return %c0_i32, %c0_i32_0 : i32, i32
  }
  func.func @transform_4(%arg0: i32, %arg1: i32) -> (i32, i32) {
    %c0_i32 = arith.constant 0 : i32
    %c0_i32_0 = arith.constant 0 : i32
    %c0_i32_1 = arith.constant 0 : i32
    return %c0_i32, %c0_i32_0 : i32, i32
  }
  func.func @transform_5(%arg0: i32, %arg1: i32) -> (i32, i32) {
    %c0_i32 = arith.constant 0 : i32
    %c0_i32_0 = arith.constant 0 : i32
    return %arg0, %c0_i32 : i32, i32
  }
}

</mosaic_0001>

<bundles_post_ra>
// kernel: tpu_custom_call.1
= control target key start
LH: loop header
LB: loop body
LE: loop exit
PB: predicated region body
PF: predicated region fallthrough
CT: control target
= control target key end

     0   :  { %s1335_s0 = inlined_call_operand.hbm [shape: bf16[16,768], index: 0, kind: input, shape index: {}]   ;;  %s1336_s1 = inlined_call_operand.hbm [shape: bf16[768,128], index: 1, kind: input, shape index: {}]   ;;  %s1337_s2 = inlined_call_operand.vmem [shape: f32[1,128], index: 2, kind: input, shape index: {}]   ;;  %s1338_s3 = inlined_call_operand.hbm [shape: bf16[128,128], index: 3, kind: input, shape index: {}]   ;;  %s1339_s4 = inlined_call_operand.vmem [shape: f32[1,128], index: 4, kind: input, shape index: {}]   ;;  %s1340_s5 = inlined_call_operand.hbm [shape: f32[16,128], index: 5, kind: output, shape index: {}]  }
   0x1   :  { %1345 = sst [smem:[#allocation17_spill]] %s1335_s0 }
   0x2   :  { %1346 = sst [smem:[#allocation18_spill]] %s1338_s3 }
   0x3   :  { %10 = vsyncpa [#allocation4], 0 }
   0x4   :  { %12 = vsyncpa [#allocation4 + $0x1], 0 }
   0x5   :  { %13 = vsyncpa [#allocation7], 0 }
   0x6   :  { %15 = vsyncpa [#allocation7 + $0x1], 0 }
   0x7   :  { %16 = vsyncpa [#allocation5], 0  ;;  %s1168_s18 = smov 0   ;;  %s1170_s19 = smov 0  }
   0x8   :  { %s1172_s20 = smov 0   ;;  %s1174_s21 = smov 0  }
   0x9   :  { %s1176_s22 = smov 0   ;;  %s1178_s23 = smov 0  }
   0xa LB: > { %1347 = sst [smem:[#allocation14_spill]] %s1114_s20  ;;  %s1197_s24 = sadd.s32 4294967295, %s1126_s23   ;;  %s1126_s23 = sphi %s1178_s23, %s22_s23   ;;  %s1122_s22 = sphi %s1176_s22, %s1364_s22   ;;  %s1118_s21 = sphi %s1174_s21, %s1363_s21   ;;  %s1114_s20 = sphi %s1172_s20, %s1359_s20   ;;  %s1110_s19 = sphi %s1170_s19, %s1362_s19   ;;  %s1106_s18 = sphi %s1168_s18, %s1361_s18  }
   0xb   : > { %p56_p0 = scmp.ne.s32.totalorder %s1110_s19, %s1106_s18  ;;  %p57_p1 = scmp.eq.s32.totalorder %s1197_s24, 0 }
   0xc   : > { %p707_p2 = scmp.ge.s32.totalorder %s1126_s23, 1  ;;  %p182_p3 = scmp.lt.s32.totalorder %s1126_s23, 4 }
   0xd   : > { %p1205_p4 = por %p57_p1, %p56_p0  ;;  %s1349_s3 = sld [smem:[#allocation18_spill]] }
   0xe   : > { %p1212_p5 = pnand %p707_p2, %p182_p3  ;;  %s1128_s30 = smov [#allocation8]  }
   0xf   : > { %s198_s6 = sshll.u32 %s1128_s30, 4  ;;  %s1341_s7 = smov 64   ;;  %s199_s6 = int_to_ptr.vmem [resolvable:$true] %s198_s6 }
  0x10   : > { %p870_p6 = pneg %p1212_p5  ;;  %s1342_s8 = smov 4  }
  0x11   : > { %s31_s9 = sadd.s32 1, %s1122_s22  ;;  %s43_s10 = sadd.s32 1, %s1114_s20 }
  0x12   : > { %p871_p7 = pnand %p870_p6, %p57_p1  ;;  %p32_p8 = scmp.ge.s32.totalorder %s31_s9, 3 }
  0x13   : > { %s196_s28 = sshll.u32 %s1349_s3, 4  ;;  %p50_p9 = scmp.ne.s32.totalorder %s1114_s20, %s1110_s19  ;;  %s197_s28 = int_to_ptr.hbm [resolvable:$true] %s196_s28 }
  0x14   : > { %873 = dma.hbm_to_vmem [thread:$0]  (!%p871_p7), %s197_s28, 1024, %s199_s6, [#allocation7], %s1341_s7, %s1341_s7, %s1342_s8  }
  0x15   : > { %p51_p10 = scmp.eq.s32.totalorder %s1126_s23, 0  ;;  %s1366_s9 = smov (%p32_p8, %s31_s9), 0 }
  0x16   : > { %1351 = sst [smem:[#allocation15_spill]] %s1366_s9  ;;  %p882_p12 = scmp.lt.s32.totalorder %s1126_s23, 3 }
  0x17   : > { %p1230_p11 = por %p51_p10, %p50_p9  ;;  %s39_s12 = ssub.s32 %s1122_s22, %s1366_s9 }
  0x18   : > { %s215_s13 = sand.u32 1, %s1114_s20   ;;  %p41_p13 = scmp.eq.s32.totalorder %s39_s12, 0 }
  0x19   : > { %s710_s14 = sshll.u32 %s215_s13, 4  ;;  %s830_s15 = sshll.u32 %s1122_s22, 3 }
  0x1a   : > { %s1240_s16 = scalar_select %p41_p13, %s1114_s20, %s43_s10  }
  0x1b   : > { %s1354_s0 = sld [smem:[#allocation17_spill]]  ;;  %s219_s28 = scalar_lea.vmem [#allocation3], %s710_s14 }
  0x1c   : > { %1353 = sst [smem:[#allocation16_spill]] %s1240_s16  ;;  %s230_s30 = sshll.u32 %s219_s28, 4  ;;  %s231_s30 = int_to_ptr.vmem [resolvable:$true] %s230_s30 }
  0x1d   : > { %p1249_p0 = pnand %p882_p12, %p1230_p11  ;;  %s240_s12 = sand.u32 1, %s1126_s23  }
  0x1e   : > { %s216_s10 = scalar_lea.sflag [#allocation4], %s215_s13  ;;  %s1131_s7 = smov 384  }
  0x1f   : > { %s1132_s8 = smov 128   ;;  %s1133_s3 = smov 8  }
  0x20   : > { %s831_s14 = sshll.u32 %s1122_s22, 7  ;;  %s241_s9 = scalar_lea.sflag [#allocation7], %s240_s12 }
  0x21   : > { %s227_s26 = scalar_lea.hbm %s1354_s0, %s830_s15  ;;  %s713_s15 = sshll.u32 %s215_s13, 7 }
  0x22   : > { %s228_s27 = sshll.u32 %s227_s26, 4  ;;  %s249_s11 = scalar_lea.hbm %s1336_s1, %s831_s14  ;;  %s229_s27 = int_to_ptr.hbm [resolvable:$true] %s228_s27 }
  0x23   : > { %877 = dma.hbm_to_vmem [thread:$0]  (!%p1249_p0), %s229_s27, 256, %s231_s30, %s216_s10, %s1131_s7, %s1132_s8, %s1133_s3  }
  0x24   : > { %s244_s26 = scalar_lea.vmem [#allocation6], %s713_s15  ;;  %s250_s0 = sshll.u32 %s249_s11, 4  ;;  %s251_s0 = int_to_ptr.hbm [resolvable:$true] %s250_s0 }
  0x25   : > { %s252_s28 = sshll.u32 %s244_s26, 4  ;;  %s1356_s16 = smov 4   ;;  %s253_s28 = int_to_ptr.vmem [resolvable:$true] %s252_s28 }
  0x26   : > { %s1357_s20 = smov 64   ;;  %264 = sbr.rel (%p1212_p5) target bundleno = 406 (0x196), region = 40 }
  0x27   : > { %880 = dma.hbm_to_vmem [thread:$0]  (!%p1249_p0), %s251_s0, 2048, %s253_s28, %s241_s9, %s1357_s20, %s1357_s20, %s1356_s16  }
  0x28   : > { %s266_s3 = sand.u32 (!%p1212_p5), 1, %s1110_s19  }
  0x29   : > { %s717_s7 = sshll.u32 (!%p1212_p5), %s266_s3, 4  ;;  %s267_s8 = scalar_lea.sflag (!%p1212_p5), [#allocation4], %s266_s3 }
  0x2a   : > { %s1268_s13 = scalar_lea.vmem (!%p1212_p5), [#allocation3], %s717_s7 }
  0x2b   : > { %1089 = dma.done.wait (%p1205_p4), %s267_s8, 256  }
  0x2c   : > { %1091 = vsyncadd (%p1205_p4), %s267_s8, 4294967040  ;;  %s276_s27 = sand.u32 1, %s1197_s24   ;;  %s718_s30 = sshll.u32 %s266_s3, 7 }
  0x2d   : > { %s277_s0 = scalar_lea.sflag [#allocation7], %s276_s27  ;;  %s1275_s20 = scalar_lea.vmem [#allocation6], %s718_s30 }
  0x2e   : > { %1093 = dma.done.wait (%p1205_p4), %s277_s0, 2048  }
  0x2f   : > { %1095 = vsyncadd (%p1205_p4), %s277_s0, 4294965248 }
  0x30   : > { %1097 = dma.done.wait (%p57_p1), [#allocation7], 1024  }
  0x31   : > { %1099 = vsyncadd (%p57_p1), [#allocation7], 4294966272  ;;  %p720_p2 = scmp.ne.s32.totalorder %s1118_s21, 0 }
  0x33   : > { %320 = sbr.rel (%p720_p2) target bundleno = 59 (0x3b), region = 56 }
  0x38   : > { %v1134_v0 = vmov 0.0  }
  0x39   : > { %321 = vst [vmem:[#allocation2] sm:$0xff] %v1134_v0 }
  0x3a   : > { %322 = vst [vmem:[#allocation2 + $0x8] sm:$0xff] %v1134_v0 }
  0x3b PF: > { %v841_v1 = vld [vmem:[%s1275_s20 + $0x38] sm:$0xff]  ;;  %v840_v3 = vld [vmem:[%s1275_s20 + $0x30] sm:$0xff]  ;;  %v839_v5 = vld [vmem:[%s1275_s20 + $0x28] sm:$0xff]  ;;  %p793_p1 = scmp.ne.s32.totalorder %s1118_s21, 2 }
  0x3c   : > { %v849_v2 = vld [vmem:[%s1275_s20 + $0x78] sm:$0xff]  ;;  %465 = vmatpush.bf16.msra.mxu0 %v841_v1  ;;  %v848_v4 = vld [vmem:[%s1275_s20 + $0x70] sm:$0xff]  ;;  %v847_v6 = vld [vmem:[%s1275_s20 + $0x68] sm:$0xff] }
  0x3d   : > { %479 = vmatpush.bf16.msra.mxu1 %v849_v2  ;;  %v838_v7 = vld [vmem:[%s1275_s20 + $0x20] sm:$0xff]  ;;  %v837_v9 = vld [vmem:[%s1275_s20 + $0x18] sm:$0xff]  ;;  %v836_v11 = vld [vmem:[%s1275_s20 + $0x10] sm:$0xff] }
  0x3e   : > { %v846_v8 = vld [vmem:[%s1275_s20 + $0x60] sm:$0xff]  ;;  %v845_v10 = vld [vmem:[%s1275_s20 + $0x58] sm:$0xff]  ;;  %v844_v12 = vld [vmem:[%s1275_s20 + $0x50] sm:$0xff] }
  0x3f   : > { %v835_v13 = vld [vmem:[%s1275_s20 + $0x8] sm:$0xff]  ;;  %v834_v15 = vld [vmem:[%s1275_s20] sm:$0xff] }
  0x40   : > { %466 = vmatpush.bf16.msra.mxu0 %v840_v3  ;;  %v843_v14 = vld [vmem:[%s1275_s20 + $0x48] sm:$0xff]  ;;  %v842_v16 = vld [vmem:[%s1275_s20 + $0x40] sm:$0xff]  ;;  %v323_v24 = vld [vmem:[#allocation2] sm:$0xff] }
  0x41   : > { %480 = vmatpush.bf16.msra.mxu1 %v848_v4  ;;  %v723_v17 = vld [vmem:[%s1268_s13] sm:$0xf]  ;;  %v833_v18 = vld [vmem:[%s1268_s13 + $0x4] sm:$0xf0]  ;;  %v832_v19 = vld [vmem:[%s1268_s13 + $0x4] sm:$0xf] }
  0x42   : > { %v725_v20 = vld [vmem:[%s1268_s13 + $0x8] sm:$0xf0]  ;;  %v724_v21 = vor.u32 %v833_v18, %v723_v17 }
  0x43   : > { %v728_v22 = vor.u32 %v832_v19, %v725_v20  ;;  %v324_v29 = vld [vmem:[#allocation2 + $0x8] sm:$0xff] }
  0x44   : > { %467 = vmatpush.bf16.msra.mxu0 %v839_v5 }
  0x45   : > { %481 = vmatpush.bf16.msra.mxu1 %v847_v6 }
  0x48   : > { %468 = vmatpush.bf16.msra.mxu0 %v838_v7 }
  0x49   : > { %482 = vmatpush.bf16.msra.mxu1 %v846_v8 }
  0x4c   : > { %469 = vmatpush.bf16.msra.mxu0 %v837_v9 }
  0x4d   : > { %483 = vmatpush.bf16.msra.mxu1 %v845_v10 }
  0x50   : > { %470 = vmatpush.bf16.msra.mxu0 %v836_v11 }
  0x51   : > { %484 = vmatpush.bf16.msra.mxu1 %v844_v12 }
  0x54   : > { %471 = vmatpush.bf16.msra.mxu0 %v835_v13 }
  0x55   : > { %485 = vmatpush.bf16.msra.mxu1 %v843_v14 }
  0x58   : > { %472 = vmatpush.bf16.msra.mxu0 %v834_v15 }
  0x59   : > { %486 = vmatpush.bf16.msra.mxu1 %v842_v16 }
  0x5b   : > { %473 = vmatmul.bf16.vlgmr.msra.gmra.mxu0 %v724_v21 }
  0x5c   : > { %487 = vmatmul.bf16.vlgmr.msra.gmra.mxu1 %v728_v22 }
  0xd8   : > { %v474_v23 = vpop.f32.mrf.mxu0 }
  0xd9   : > { %v488_v25 = vpop.f32.mrf.mxu1 }
  0xda   : > { %v489_v26 = vadd.f32 %v488_v25, %v474_v23 }
  0xdc   : > { %v493_v27 = vadd.f32 %v489_v26, %v323_v24 }
  0xde   : > { %495 = vst [vmem:[#allocation2] sm:$0xff] %v493_v27 }
  0xe0   : > { %v476_v28 = vpop.f32.mrf.mxu0 }
  0xe1   : > { %v490_v30 = vpop.f32.mrf.mxu1 }
  0xe2   : > { %v491_v31 = vadd.f32 %v490_v30, %v476_v28  ;;  %500 = sbr.rel (%p793_p1) target bundleno = 400 (0x190), region = 60 }
  0xe4   : > { %v494_v32 = vadd.f32 %v491_v31, %v324_v29 }
  0xe6   : > { %496 = vst [vmem:[#allocation2 + $0x8] sm:$0xff] %v494_v32 }
  0xe7   : > { %v857_v33 = vld [vmem:[#allocation8 + $0x38] sm:$0xff]  ;;  %v856_v34 = vld [vmem:[#allocation8 + $0x30] sm:$0xff]  ;;  %v855_v35 = vld [vmem:[#allocation8 + $0x28] sm:$0xff] }
  0xe8   : > { %580 = vmatpush.bf16.msra.mxu0 %v857_v33  ;;  %v854_v36 = vld [vmem:[#allocation8 + $0x20] sm:$0xff]  ;;  %v853_v37 = vld [vmem:[#allocation8 + $0x18] sm:$0xff]  ;;  %v944_v38 = vld [vmem:[%s1337_s2] ss:$0 sm:$0xff] }
  0xe9   : > { %v852_v39 = vld [vmem:[#allocation8 + $0x10] sm:$0xff]  ;;  %v851_v44 = vld [vmem:[#allocation8 + $0x8] sm:$0xff]  ;;  %v850_v47 = vld [vmem:[#allocation8] sm:$0xff] }
  0xea   : > { %v501_v40 = vld [vmem:[#allocation2] sm:$0xff] }
  0xeb   : > { %v507_v42 = vadd.f32 %v944_v38, %v501_v40  ;;  %v945_v49 = vld [vmem:[%s1339_s4] ss:$0 sm:$0xff] }
  0xec   : > { %581 = vmatpush.bf16.msra.mxu0 %v856_v34 }
  0xed   : > { %v502_v41 = vld [vmem:[#allocation2 + $0x8] sm:$0xff]  ;;  %v509_v45 = vmax.f32 %v507_v42, 0.0 }
  0xee   : > { %v508_v43 = vadd.f32 %v944_v38, %v502_v41 }
  0xf0   : > { %582 = vmatpush.bf16.msra.mxu0 %v855_v35  ;;  %v510_v46 = vmax.f32 %v508_v43, 0.0 }
  0xf2   : > { %v511_v48 = vpack.c.bf16 %v510_v46, %v509_v45 }
  0xf4   : > { %583 = vmatpush.bf16.msra.mxu0 %v854_v36 }
  0xf8   : > { %584 = vmatpush.bf16.msra.mxu0 %v853_v37 }
  0xfc   : > { %585 = vmatpush.bf16.msra.mxu0 %v852_v39 }
 0x100   : > { %586 = vmatpush.bf16.msra.mxu0 %v851_v44 }
 0x104   : > { %587 = vmatpush.bf16.msra.mxu0 %v850_v47 }
 0x107   : > { %588 = vmatmul.bf16.vlgmr.msra.gmra.mxu0 %v511_v48 }
 0x184   : > { %v589_v50 = vpop.f32.mrf.mxu0 }
 0x185   : > { %v590_v51 = vadd.f32 %v945_v49, %v589_v50 }
 0x187   : > { %594 = vst [vmem:[#allocation9] sm:$0xff] %v590_v51 }
 0x18c   : > { %v591_v52 = vpop.f32.mrf.mxu0 }
 0x18d   : > { %v592_v53 = vadd.f32 %v945_v49, %v591_v52 }
 0x18f   : > { %595 = vst [vmem:[#allocation9 + $0x8] sm:$0xff] %v592_v53 }
 0x190 PF: > { %p884_p3 = scmp.eq.s32.totalorder %s1197_s24, 2  ;;  %s606_s12 = sshll.u32 %s1340_s5, 4  ;;  %s607_s12 = int_to_ptr.hbm [resolvable:$true] %s606_s12 }
 0x191   : > { %s1135_s10 = smov [#allocation9]   ;;  %s1136_s14 = smov 128  }
 0x192   : > { %s604_s15 = sshll.u32 %s1135_s10, 4  ;;  %s1137_s17 = smov 8   ;;  %s605_s15 = int_to_ptr.vmem [resolvable:$true] %s604_s15 }
 0x193   : > { %867 = dma.vmem_to_hbm [thread:$0]  (%p884_p3), %s605_s15, 256, %s607_s12, [#allocation5], %s1136_s14, %s1136_s14, %s1137_s17  }
 0x194   : > { %1101 = dma.done.wait (%p884_p3), [#allocation5], 256  }
 0x195   : > { %1103 = vsyncadd (%p884_p3), [#allocation5], 4294967040 }
 0x196 PF: > { %s22_s23 = sadd.s32 1, %s1126_s23   ;;  %s1358_s11 = sld [smem:[#allocation14_spill]] }
 0x197   : > { %p19_p4 = scmp.ge.s32.totalorder %s22_s23, 5   ;;  %s1359_s20 = sld [smem:[#allocation16_spill]] }
 0x198   : > { %s1360_s24 = sld [smem:[#allocation15_spill]]  ;;  %s1361_s18 = smov %s1110_s19 }
 0x199   : > { %s1363_s21 = smov %s1122_s22 }
 0x19a   :  { %21 = sbr.rel (!%p19_p4) target bundleno = 10 (0xa), region = 103 }
 0x19c   : > { %s1362_s19 = smov %s1358_s11 }
 0x19e   : > { %s1364_s22 = smov %s1360_s24 }
 0x19f   :  { %623 = vsyncpa [#allocation4], 1 }
 0x1a0   :  { %625 = vsyncpa [#allocation4 + $0x1], 1 }
 0x1a1   :  { %626 = vsyncpa [#allocation7], 1 }
 0x1a2   :  { %628 = vsyncpa [#allocation7 + $0x1], 1 }
 0x1a3   :  { %629 = vsyncpa [#allocation5], 1 }
 0x1a4   :  { %631 = vsyncpa [#allocation5 + $0x1], 1 }

</bundles_post_ra>
